<compile_context>
chip_gen: v7x
topology: tpu7x:2x2x1
jax: 0.10.0
libtpu: 0.0.40
codegen_flags: <defaults>
</compile_context>

<pallas_src>
import functools
import math

import jax
import jax.numpy as jnp
from jax.experimental import pallas as pl
from jax.experimental.pallas import tpu as pltpu

_TN_CAP = 2048  # max pixel (lane) tile; worst-case VMEM use stays < ~5 MB


def _round_up(v, m):
    return (v + m - 1) // m * m


# ----------------------------------------------------------------------------
# Pallas kernel: lane-dense fused (W_T @ X_T + b) -> act -> (+ residual)
# ----------------------------------------------------------------------------
def _gemm_kernel(w_ref, x_ref, b_ref, *rest, act, has_res):
    if has_res:
        r_ref, o_ref = rest
    else:
        (o_ref,) = rest
    # bf16 operands, f32 accumulation on the MXU.
    y = jnp.dot(w_ref[...], x_ref[...], preferred_element_type=jnp.float32)
    y = y + b_ref[...]                      # (Cout, 1) broadcast over lanes
    if act == "lrelu":
        y = jnp.where(y >= 0.0, y, 0.1 * y)
    if has_res:
        y = y + r_ref[...]
    o_ref[...] = y.astype(o_ref.dtype)


def gemm_bias_act(w_t, x_t, b, res=None, *, act="none"):
    """out[:Cout, :M] = act(w_t @ x_t + b) (+ res).  w_t:(Cout,K) x_t:(K,M)."""
    Cout, K = w_t.shape
    K2, M = x_t.shape
    assert K == K2
    # Pad Cout / K to friendly multiples (cheap; avoids odd sublane shapes).
    Cp = _round_up(max(Cout, 8), 8)
    Kp = _round_up(max(K, 16), 16)
    if Kp != K:
        w_t = jnp.pad(w_t, ((0, 0), (0, Kp - K)))
        x_t = jnp.pad(x_t, ((0, Kp - K), (0, 0)))
    if Cp != Cout:
        w_t = jnp.pad(w_t, ((0, Cp - Cout), (0, 0)))
        b = jnp.pad(b, (0, Cp - Cout))
        if res is not None:
            res = jnp.pad(res, ((0, Cp - Cout), (0, 0)))
    # Pixel (lane) tiling: as few grid steps as possible, tiles <= _TN_CAP.
    steps = max(1, -(-M // _TN_CAP))
    tn = _round_up(-(-M // steps), 128)
    Mp = tn * steps
    if Mp != M:
        x_t = jnp.pad(x_t, ((0, 0), (0, Mp - M)))
        if res is not None:
            res = jnp.pad(res, ((0, 0), (0, Mp - M)))

    in_specs = [
        pl.BlockSpec((Cp, Kp), lambda i: (0, 0)),   # weights: grid-invariant, resident
        pl.BlockSpec((Kp, tn), lambda i: (0, i)),   # streamed pixel tiles
        pl.BlockSpec((Cp, 1), lambda i: (0, 0)),    # bias
    ]
    args = [w_t.astype(jnp.bfloat16), x_t.astype(jnp.bfloat16),
            b.reshape(Cp, 1).astype(jnp.float32)]
    has_res = res is not None
    if has_res:
        in_specs.append(pl.BlockSpec((Cp, tn), lambda i: (0, i)))
        args.append(res.astype(jnp.float32))

    out = pl.pallas_call(
        functools.partial(_gemm_kernel, act=act, has_res=has_res),
        out_shape=jax.ShapeDtypeStruct((Cp, Mp), jnp.float32),
        grid=(steps,),
        in_specs=in_specs,
        out_specs=pl.BlockSpec((Cp, tn), lambda i: (0, i)),
        compiler_params=pltpu.CompilerParams(dimension_semantics=("parallel",)),
    )(*args)
    return out[:Cout, :M]


# ----------------------------------------------------------------------------
# conv2d = channel-major im2col (XLA glue) + Pallas lane-dense GEMM kernel
# ----------------------------------------------------------------------------
# TODO(synk): move the kh*kw tap gather into the kernel as a trailing
# "arbitrary" reduction grid axis (scratch accumulator) to avoid materializing
# the (K, M) patch matrix in HBM entirely.
@functools.partial(jax.jit, static_argnames=("kh", "kw", "stride", "pad", "act"))
def conv2d(x, w_t, b, res=None, *, kh, kw, stride=1, pad=0, act="none"):
    """x: (Cin, N, H, W); w_t: (Cout, kh*kw*Cin); b: (Cout,); res: (Cout,N,Ho,Wo)."""
    Cin, N, H, W = x.shape
    Cout = w_t.shape[0]
    xb = x.astype(jnp.bfloat16)              # halve HBM traffic of the patches
    if pad:
        xb = jnp.pad(xb, ((0, 0), (0, 0), (pad, pad), (pad, pad)))
    Hp, Wp = H + 2 * pad, W + 2 * pad
    Ho = (Hp - kh) // stride + 1
    Wo = (Wp - kw) // stride + 1
    taps = []
    for i in range(kh):
        for j in range(kw):
            taps.append(xb[:, :, i:i + stride * (Ho - 1) + 1:stride,
                           j:j + stride * (Wo - 1) + 1:stride])
    xt = taps[0] if len(taps) == 1 else jnp.stack(taps, axis=0)
    xt = xt.reshape(kh * kw * Cin, N * Ho * Wo)        # (K, M): tap-major rows
    r2 = None if res is None else res.reshape(Cout, N * Ho * Wo).astype(jnp.float32)
    y = gemm_bias_act(w_t, xt, b, r2, act=act)         # (Cout, M)
    return y.reshape(Cout, N, Ho, Wo)


def C(x, p, stride, pad, act="none", res=None):
    return conv2d(x, p["w"], p["b"], res, kh=p["kh"], kw=p["kw"],
                  stride=stride, pad=pad, act=act)


# ----------------------------------------------------------------------------
# Interpolation helpers (plain JAX glue; gather-dominated, not the hot path)
# ----------------------------------------------------------------------------
def _interp_axis_linear(x, axis, scale):
    n = x.shape[axis]
    out_n = n * scale
    i = jnp.arange(out_n)
    src = (i + 0.5) / scale - 0.5
    i0 = jnp.floor(src)
    t = (src - i0).astype(x.dtype)
    i0 = i0.astype(jnp.int32)
    a0 = jnp.take(x, jnp.clip(i0, 0, n - 1), axis=axis)
    a1 = jnp.take(x, jnp.clip(i0 + 1, 0, n - 1), axis=axis)
    shp = [1] * x.ndim
    shp[axis] = out_n
    t = t.reshape(shp)
    return a0 * (1 - t) + a1 * t


@functools.partial(jax.jit, static_argnames=("scale",))
def bilinear_up(x, *, scale):
    # matches F.interpolate(mode='bilinear', align_corners=False)
    x = _interp_axis_linear(x, 2, scale)
    x = _interp_axis_linear(x, 3, scale)
    return x


def _cubic_w(x, a=-0.75):
    x = jnp.abs(x)
    return jnp.where(
        x <= 1.0, (a + 2) * x ** 3 - (a + 3) * x ** 2 + 1.0,
        jnp.where(x < 2.0, a * x ** 3 - 5 * a * x ** 2 + 8 * a * x - 4 * a, 0.0))


def _interp_axis_cubic(x, axis, scale):
    n = x.shape[axis]
    out_n = n * scale
    i = jnp.arange(out_n)
    src = (i + 0.5) / scale - 0.5
    i0 = jnp.floor(src)
    t = (src - i0).astype(x.dtype)
    i0 = i0.astype(jnp.int32)
    shp = [1] * x.ndim
    shp[axis] = out_n
    out = jnp.zeros(x.shape[:axis] + (out_n,) + x.shape[axis + 1:], x.dtype)
    for k in range(4):
        idx = jnp.clip(i0 + (k - 1), 0, n - 1)
        a = jnp.take(x, idx, axis=axis)
        w = _cubic_w(t - (k - 1))
        out = out + a * w.reshape(shp)
    return out


@jax.jit
def bicubic_up2(x):
    # matches F.interpolate(mode='bicubic', align_corners=False), a = -0.75
    x = _interp_axis_cubic(x, 2, 2)
    x = _interp_axis_cubic(x, 3, 2)
    return x


# ----------------------------------------------------------------------------
# SE-layer FCs: tiny (25x16x1) matmuls -> plain XLA, not a Pallas launch
# ----------------------------------------------------------------------------
@jax.jit
def _se_scale(fm, w1, b1, w2, b2):
    pooled = jnp.mean(fm, axis=(2, 3))                            # (C, N)
    h = jnp.maximum(jnp.dot(w1.astype(jnp.float32), pooled) + b1[:, None], 0.0)
    att = jax.nn.sigmoid(jnp.dot(w2.astype(jnp.float32), h) + b2[:, None])
    return fm * att[:, :, None, None]


# ----------------------------------------------------------------------------
# Parameter construction (deterministic, kaiming-normal-like; biases zero)
# Weights are stored pre-transposed as (Cout, kh*kw*Cin) in bf16.
# ----------------------------------------------------------------------------
class KeyGen:
    def __init__(self, key):
        self.key = key

    def __call__(self):
        self.key, k = jax.random.split(self.key)
        return k


def make_conv(kg, kh, kw, cin, cout, scale=1.0):
    fan_in = kh * kw * cin
    std = math.sqrt(2.0 / fan_in)
    w = jax.random.normal(kg(), (cout, kh * kw * cin), jnp.float32) * std * scale
    return {"w": w.astype(jnp.bfloat16),
            "b": jnp.zeros((cout,), jnp.float32),   # bias=False convs keep zero bias
            "kh": kh, "kw": kw}


def make_pf_block(kg, nf, ang):
    return {
        "enc": make_conv(kg, 3, 3, nf, nf),
        "fusion": make_conv(kg, 1, 1, nf * ang, nf, scale=0.1),
        "dec": make_conv(kg, 3, 3, 2 * nf, nf, scale=0.1),
    }


def make_down_module(kg, nf, ang):
    return {"conv": make_conv(kg, 5, 5, nf, nf), "pf": make_pf_block(kg, nf, ang)}


def make_up_module(kg, nf, ang):
    return {"conv": make_conv(kg, 3, 3, nf, nf), "pf": make_pf_block(kg, nf, ang)}


def make_down_proj(kg, nf, ang):
    return {"d1": make_down_module(kg, nf, ang),
            "u2": make_up_module(kg, nf, ang),
            "d3": make_down_module(kg, nf, ang)}


def make_up_proj(kg, nf, ang):
    return {"u1": make_up_module(kg, nf, ang),
            "d2": make_down_module(kg, nf, ang),
            "u3": make_up_module(kg, nf, ang)}


def make_rb(kg, c):
    return {"c1": make_conv(kg, 3, 3, c, c), "c2": make_conv(kg, 3, 3, c, c)}


def make_se(kg, c, g=16):
    return {"c1": make_conv(kg, 1, 1, c, c // g), "c2": make_conv(kg, 1, 1, c // g, c)}


def make_fbm(kg, c):
    return {"rb": [make_rb(kg, c) for _ in range(4)],
            "se": [make_se(kg, c) for _ in range(4)]}


def make_upsample(kg, c):
    return {"c1": make_conv(kg, 3, 3, c, 2 * c),
            "c2": make_conv(kg, 1, 1, 2 * c, c),
            "c3": make_conv(kg, 1, 1, c, 1)}


def make_net(kg, channel, ang_res):
    ang = ang_res * ang_res
    p = {
        "highF": make_conv(kg, 3, 3, 1, channel),
        "midF": make_conv(kg, 3, 3, 1, channel),
        "lowF": make_conv(kg, 3, 3, 1, channel),
        "conv1": make_conv(kg, 3, 3, 2 * channel, channel),
        "conv2": make_conv(kg, 3, 3, 2 * channel, channel),
        "conv3": make_conv(kg, 3, 3, 3 * channel, channel),
        "fbm": make_fbm(kg, channel),
        "ups": make_upsample(kg, channel),
    }
    for name in ["L1", "M1", "M2", "H1", "H2", "H3"]:
        p["up" + name] = make_up_proj(kg, channel, ang)
        p["dn" + name] = make_down_proj(kg, channel, ang)
    return p


# ----------------------------------------------------------------------------
# Forward passes (faithful to the PyTorch module; the 25 per-view convs of
# ProgressiveFusion_Block share weights, so they are batched into one conv).
# Internal activation layout: (C, B*an2, H, W).
# ----------------------------------------------------------------------------
def pf_block_fwd(p, x, B, A):
    Cc, BA, H, W = x.shape
    enc = C(x, p["enc"], 1, 1, act="lrelu")                       # (Cc, BA, H, W)
    # fusion input channel ordering matches torch.cat([x0..x24], 1): view-major
    enc5 = enc.reshape(Cc, B, A, H, W)
    fus_in = jnp.transpose(enc5, (2, 0, 1, 3, 4)).reshape(A * Cc, B, H, W)
    x_fus = C(fus_in, p["fusion"], 1, 0)                          # (Cc, B, H, W)
    xfb = jnp.broadcast_to(x_fus[:, :, None], (Cc, B, A, H, W)).reshape(Cc, BA, H, W)
    dec_in = jnp.concatenate([enc, xfb], axis=0)                  # (2Cc, BA, H, W)
    # residual (+ x) fused into the decoder conv epilogue
    return C(dec_in, p["dec"], 1, 1, act="lrelu", res=x)


def down_module_fwd(p, x, B, A):
    y = C(x, p["conv"], 2, 2)                                     # H,W -> H/2,W/2
    return pf_block_fwd(p["pf"], y, B, A)


def up_module_fwd(p, x, B, A):
    y = pf_block_fwd(p["pf"], x, B, A)
    y = bicubic_up2(y)
    return C(y, p["conv"], 1, 1)


def down_proj_fwd(p, x, B, A):
    l0 = down_module_fwd(p["d1"], x, B, A)
    h0 = up_module_fwd(p["u2"], l0, B, A)
    l1 = down_module_fwd(p["d3"], h0 - x, B, A)
    return l1 + l0


def up_proj_fwd(p, x, B, A):
    h0 = up_module_fwd(p["u1"], x, B, A)
    l0 = down_module_fwd(p["d2"], h0, B, A)
    h1 = up_module_fwd(p["u3"], l0 - x, B, A)
    return h1 + h0


def rb_fwd(p, x):
    buf = C(x, p["c1"], 1, 1, act="lrelu")
    return C(buf, p["c2"], 1, 1, res=x)                           # residual fused


def se_fwd(p, fm):
    return _se_scale(fm, p["c1"]["w"], p["c1"]["b"], p["c2"]["w"], p["c2"]["b"])


def fbm_fwd(p, x):
    buf = x
    for i in range(4):
        buf = se_fwd(p["se"][i], rb_fwd(p["rb"][i], buf))
    return buf


def upsample_fwd(p, x):
    y = C(x, p["c1"], 1, 1)
    y = C(y, p["c2"], 1, 0)
    y = C(y, p["c3"], 1, 0)                                       # (1, BA, H, W)
    return y


def net_fwd(p, lf_lr):
    B, A, H, W = lf_lr.shape
    x = lf_lr.reshape(B * A, H, W)[None]                          # (1, BA, H, W)

    lowFea = C(x, p["lowF"], 4, 1)       # (C, BA, H/4, W/4)
    midFea = C(x, p["midF"], 2, 1)       # (C, BA, H/2, W/2)
    highFea = C(x, p["highF"], 1, 1)     # (C, BA, H, W)

    highFea = highFea - bilinear_up(midFea, scale=2)
    midFea = midFea - bilinear_up(lowFea, scale=2)

    lowFea = down_proj_fwd(p["dnL1"], up_proj_fwd(p["upL1"], lowFea, B, A), B, A)

    midFea1 = down_proj_fwd(p["dnM1"], up_proj_fwd(p["upM1"], midFea, B, A), B, A)
    midFea2 = jnp.concatenate([midFea1, bilinear_up(lowFea, scale=2)], axis=0)
    midFea2 = C(midFea2, p["conv1"], 1, 1)
    midFea3 = down_proj_fwd(p["dnM2"], up_proj_fwd(p["upM2"], midFea2, B, A), B, A)

    highFea1 = down_proj_fwd(p["dnH1"], up_proj_fwd(p["upH1"], highFea, B, A), B, A)
    highFea2 = down_proj_fwd(p["dnH2"], up_proj_fwd(p["upH2"], highFea1, B, A), B, A)
    highFea3 = jnp.concatenate([highFea2, bilinear_up(midFea3, scale=2)], axis=0)
    highFea3 = C(highFea3, p["conv2"], 1, 1)
    highFea4 = down_proj_fwd(p["dnH3"], up_proj_fwd(p["upH3"], highFea3, B, A), B, A)

    lowFea_final = bilinear_up(lowFea, scale=4)
    midFea_final = bilinear_up(midFea3, scale=2)
    fea = C(jnp.concatenate([highFea4, midFea_final, lowFea_final], axis=0),
            p["conv3"], 1, 1)
    fea = fbm_fwd(p["fbm"], fea)                                  # (C, BA, H, W)
    out_sv = upsample_fwd(p["ups"], fea)                          # (1, BA, H, W)
    out = out_sv[0].reshape(B, A, H, W) + lf_lr                   # (B, A, H, W)
    return out


# ----------------------------------------------------------------------------
if __name__ == "__main__":
    # opt.angular_num = 5 (an2 = 25 is hardcoded in ProgressiveFusion_Block),
    # opt.channel = 16 (SELayer uses groups g=16), opt.scale unused in forward.
    B, ang_res, channel, H, W = 1, 5, 16, 16, 16
    an2 = ang_res * ang_res

    key = jax.random.PRNGKey(0)
    k_params, k_in = jax.random.split(key)
    params = make_net(KeyGen(k_params), channel, ang_res)
    lf_lr = jax.random.normal(k_in, (B, an2, H, W), jnp.float32)

    out = net_fwd(params, lf_lr)
    out = jax.block_until_ready(out)
    assert out.shape == (B, an2, H, W), out.shape
    assert out.dtype == jnp.float32
    assert bool(jnp.isfinite(out).all())
    print("KERNEL_OK")
</pallas_src>

<mosaic_0001>
module attributes {stable_mosaic.version = 11 : i64} {
  func.func @_gemm_kernel(%arg0: i32, %arg1: memref<16x16xbf16, #tpu.memory_space<vmem>>, %arg2: memref<16x512xbf16, #tpu.memory_space<vmem>>, %arg3: memref<16x1xf32, #tpu.memory_space<vmem>>, %arg4: memref<16x512xf32, #tpu.memory_space<vmem>>) attributes {dimension_semantics = [#tpu.dimension_semantics<parallel>], iteration_bounds = array<i64: 1>, scalar_prefetch = 0 : i64, scratch_operands = 0 : i64, tpu.core_type = #tpu.core_type<tc>, window_params = [{pipeline_mode = #tpu.pipeline_mode<synchronous>, transform_indices = @transform_0, window_bounds = array<i64: 16, 16>}, {transform_indices = @transform_1, window_bounds = array<i64: 16, 512>}, {pipeline_mode = #tpu.pipeline_mode<synchronous>, transform_indices = @transform_2, window_bounds = array<i64: 16, 1>}, {transform_indices = @transform_3, window_bounds = array<i64: 16, 512>}]} {
    %c0 = arith.constant 0 : index
    %c0_0 = arith.constant 0 : index
    %0 = vector.load %arg1[%c0, %c0_0] : memref<16x16xbf16, #tpu.memory_space<vmem>>, vector<16x16xbf16>
    %c0_1 = arith.constant 0 : index
    %c0_2 = arith.constant 0 : index
    %1 = vector.load %arg2[%c0_1, %c0_2] : memref<16x512xbf16, #tpu.memory_space<vmem>>, vector<16x512xbf16>
    %cst = arith.constant dense<0.000000e+00> : vector<16x512xf32>
    %2 = tpu.matmul %0, %1, %cst {dimension_numbers = #tpu.dot_dimension_numbers<[1], [0], [0], [1], [0, 0, 1, 1], [], []>} : vector<16x16xbf16>, vector<16x512xbf16>, vector<16x512xf32> -> vector<16x512xf32>
    %c0_3 = arith.constant 0 : index
    %c0_4 = arith.constant 0 : index
    %3 = vector.load %arg3[%c0_3, %c0_4] : memref<16x1xf32, #tpu.memory_space<vmem>>, vector<16x1xf32>
    %4 = vector.broadcast %3 : vector<16x1xf32> to vector<16x512xf32>
    %5 = arith.addf %2, %4 : vector<16x512xf32>
    %c0_5 = arith.constant 0 : index
    %c0_6 = arith.constant 0 : index
    %6 = vector.load %arg4[%c0_5, %c0_6] : memref<16x512xf32, #tpu.memory_space<vmem>>, vector<16x512xf32>
    tpu.vector_store %arg4[%c0_5, %c0_6], %5 {strides = array<i32>} : memref<16x512xf32, #tpu.memory_space<vmem>>, vector<16x512xf32>,
    return
  }
  func.func @transform_0(%arg0: i32) -> (i32, i32) {
    %c0_i32 = arith.constant 0 : i32
    %c0_i32_0 = arith.constant 0 : i32
    %c0_i32_1 = arith.constant 0 : i32
    return %c0_i32, %c0_i32_0 : i32, i32
  }
  func.func @transform_1(%arg0: i32) -> (i32, i32) {
    %c0_i32 = arith.constant 0 : i32
    %c0_i32_0 = arith.constant 0 : i32
    return %c0_i32, %arg0 : i32, i32
  }
  func.func @transform_2(%arg0: i32) -> (i32, i32) {
    %c0_i32 = arith.constant 0 : i32
    %c0_i32_0 = arith.constant 0 : i32
    %c0_i32_1 = arith.constant 0 : i32
    return %c0_i32, %c0_i32_0 : i32, i32
  }
  func.func @transform_3(%arg0: i32) -> (i32, i32) {
    %c0_i32 = arith.constant 0 : i32
    %c0_i32_0 = arith.constant 0 : i32
    return %c0_i32, %arg0 : i32, i32
  }
}

</mosaic_0001>

<bundles_post_ra>
// kernel: conv2d.1
= control target key start
LH: loop header
LB: loop body
LE: loop exit
PB: predicated region body
PF: predicated region fallthrough
CT: control target
= control target key end

     0   :  { %v176_v1 = vmov 0   ;;  %vm58_vm0 = vcmask 130048   ;;  %s242_s1 = inlined_call_operand.vmem [shape: bf16[16,512], index: 1, kind: input, shape index: {}]   ;;  %s243_s0 = inlined_call_operand.vmem [shape: bf16[16,16], index: 0, kind: input, shape index: {}]   ;;  %s244_s2 = inlined_call_operand.vmem [shape: f32[16,1], index: 2, kind: input, shape index: {}]   ;;  %s245_s3 = inlined_call_operand.vmem [shape: f32[16,512], index: 3, kind: output, shape index: {}]  }
   0x1   :  { %v169_v0 = vld [vmem:[%s242_s1 + $0x4] ss:$16 sps:$4 sm:$0xff]   ;;  %94 = vmatprep.mubr.bf16.mxu0 %v176_v1  ;;  %137 = vmatprep.mubr.bf16.mxu1 %v176_v1  ;;  %v171_v2 = vld [vmem:[%s242_s1 + $0xc] ss:$16 sps:$4 sm:$0xff]   ;;  %v173_v3 = vld [vmem:[%s242_s1] ss:$16 sps:$4 sm:$0xff]  }
   0x2   :  { %168 = vset.pattern.permute.xlu0 %v176_v1  ;;  %62 = vmatprep.subr.bf16.mxu0 %v169_v0  ;;  %v174_v4 = vld [vmem:[%s242_s1 + $0x8] ss:$16 sps:$4 sm:$0xff]   ;;  %v175_v5 = vld [vmem:[%s243_s0] sm:$0xff]  }
   0x3   :  { %105 = vmatprep.subr.bf16.mxu1 %v171_v2  ;;  %v21_v6 = vld [vmem:[%s244_s2] sm:$0xff]  ;;  %63 = vmatpush1.bf16.msra.mxu0 %v173_v3  ;;  %v22_v7 = vld [vmem:[%s244_s2 + $0x8] sm:$0xff] }
   0x4   :  { %106 = vmatpush1.bf16.msra.mxu1 %v174_v4  ;;  %25 = vperm.xlu0 %168, %v21_v6  }
   0x6   :  { %165 = vmatmul.mubr.msk.bf16.vlgmr.msra.gmra.mrb[0].mxu0 %vm58_vm0, %v175_v5 }
   0x7   :  { %166 = vmatmul.mubr.msk.bf16.vlgmr.msra.gmra.mrb[0].mxu1 %vm58_vm0, %v175_v5 }
   0x8   :  { %30 = vperm.xlu0 %168, %v22_v7  }
  0x83   :  { %v26_v8 = vpop.permute.xlu0 %25 }
  0x87   :  { %v31_v9 = vpop.permute.xlu0 %30 }
  0xd9   :  { %v96_v10 = vpop.f32.mrb[0].mxu0 }
  0xda   :  { %v139_v11 = vpop.f32.mrb[0].mxu1  ;;  %v97_v12 = vadd.f32 %v96_v10, %v26_v8  ;;  %v98_v14 = vpop.f32.mrb[1].mxu0 }
  0xdb   :  { %v140_v13 = vadd.f32 %v139_v11, %v26_v8  ;;  %v141_v15 = vpop.f32.mrb[1].mxu1  ;;  %v99_v16 = vadd.f32 %v98_v14, %v26_v8  ;;  %v100_v18 = vpop.f32.mrb[2].mxu0 }
  0xdc   :  { %v142_v17 = vadd.f32 %v141_v15, %v26_v8  ;;  %v143_v19 = vpop.f32.mrb[2].mxu1  ;;  %148 = vst [vmem:[%s245_s3] sm:$0xff] %v97_v12  ;;  %v101_v20 = vadd.f32 %v100_v18, %v31_v9  ;;  %v102_v22 = vpop.f32.mrb[3].mxu0 }
  0xdd   :  { %150 = vst [vmem:[%s245_s3 + $0x10] sm:$0xff] %v140_v13  ;;  %v144_v21 = vadd.f32 %v143_v19, %v31_v9  ;;  %v145_v23 = vpop.f32.mrb[3].mxu1  ;;  %149 = vst [vmem:[%s245_s3 + $0x8] sm:$0xff] %v99_v16  ;;  %v103_v24 = vadd.f32 %v102_v22, %v31_v9 }
  0xde   :  { %151 = vst [vmem:[%s245_s3 + $0x18] sm:$0xff] %v142_v17  ;;  %v146_v25 = vadd.f32 %v145_v23, %v31_v9  ;;  %152 = vst [vmem:[%s245_s3 + $0x20] sm:$0xff] %v101_v20 }
  0xdf   :  { %154 = vst [vmem:[%s245_s3 + $0x30] sm:$0xff] %v144_v21  ;;  %153 = vst [vmem:[%s245_s3 + $0x28] sm:$0xff] %v103_v24 }
  0xe0   :  { %155 = vst [vmem:[%s245_s3 + $0x38] sm:$0xff] %v146_v25 }

</bundles_post_ra>
